<compile_context>
chip_gen: v6e
topology: v6e:2x2x1
jax: 0.10.0
libtpu: 0.0.40
codegen_flags: <defaults>
</compile_context>

<pallas_src>
import jax
import jax.numpy as jnp
from jax.experimental import pallas as pl
from jax.experimental.pallas import tpu as pltpu


def _elu(x):
    # ELU(alpha=1): x if x > 0 else exp(x) - 1  (numerically safe)
    return jnp.where(x > 0, x, jnp.exp(jnp.minimum(x, 0.0)) - 1.0)


def _softplus(x):
    # Numerically stable softplus: max(x, 0) + log1p(exp(-|x|))
    return jnp.maximum(x, 0.0) + jnp.log1p(jnp.exp(-jnp.abs(x)))


def _round_up(x, m):
    return ((x + m - 1) // m) * m


def actor_kernel(x_ref,
                 w0_ref, b0_ref,
                 w1_ref, b1_ref,
                 w2_ref, b2_ref,
                 out_ref):
    # Matmul inputs run in the weight dtype (bf16 on v6e/v7x is native MXU);
    # accumulation and all elementwise math stay in float32.
    mm_dtype = w0_ref.dtype
    x = x_ref[...].astype(mm_dtype)

    # Linear 0 + ELU
    h = jnp.dot(x, w0_ref[...], preferred_element_type=jnp.float32)
    h = h + b0_ref[...].astype(jnp.float32)
    h = _elu(h).astype(mm_dtype)

    # Linear 1 + ELU
    h = jnp.dot(h, w1_ref[...], preferred_element_type=jnp.float32)
    h = h + b1_ref[...].astype(jnp.float32)
    h = _elu(h).astype(mm_dtype)

    # Linear 2 (output layer, no activation): produces 2 * out_features
    raw = jnp.dot(h, w2_ref[...], preferred_element_type=jnp.float32)
    raw = raw + b2_ref[...].astype(jnp.float32)

    # Lane-dense single output: apply both heads full-width (tanh / softplus
    # go to the EUP, essentially free) and select by lane index. Avoids the
    # in-vreg slices raw[:, :half] / raw[:, half:] and two narrow stores.
    half = raw.shape[-1] // 2
    lane = jax.lax.broadcasted_iota(jnp.int32, raw.shape, dimension=1)
    mean_full = jnp.tanh(raw)
    std_full = _softplus(raw) + 0.0001
    out_ref[...] = jnp.where(lane < half, mean_full, std_full).astype(out_ref.dtype)


def actor_forward(state, params, *, block_b=4096):
    """Run the Actor MLP in a single Pallas kernel.

    state:  (B, in_features), float32 or bfloat16
    params: list of (W, b) with W: (in, out), b: (1, out)
    returns: (mean, stddev), each (B, out_features) float32
    """
    (w0, b0), (w1, b1), (w2, b2) = params
    B, in_f = state.shape
    h1 = int(w0.shape[1])
    h2 = int(w1.shape[1])
    two_out = int(w2.shape[1])
    out_f = two_out // 2

    # Batch tile: big enough to amortize the ~0.35 us per-grid-step overhead,
    # but capped so that (a) there are >= 2 grid steps when B is large enough
    # (lets v7x shard the "parallel" batch axis over its 2 TensorCores) and
    # (b) the double-buffered tiles fit the scoped-VMEM budget everywhere.
    TB = min(block_b, max(8, _round_up(pl.cdiv(B, 2), 8)))
    grid = (pl.cdiv(B, TB),)   # ragged last block handled by Pallas masking

    def param_spec(shape):
        # Constant index_map -> parameter block is reused across all batch
        # tiles (stays VMEM-resident, no re-DMA per grid step).
        return pl.BlockSpec(shape, lambda i: (0, 0))

    # Explicit scoped-VMEM budget: double-buffered state/out tiles, resident
    # weights, plus f32 intermediate activations. Floor at 32 MiB, cap at
    # 48 MiB so a tile tuned on v6e (128 MiB physical) can't exceed v7x's
    # 64 MiB physical VMEM and fits v5e with headroom.
    bytes_state = TB * in_f * state.dtype.itemsize
    bytes_out = TB * two_out * 4
    bytes_params = sum(int(w.size) * w.dtype.itemsize +
                       int(b.size) * b.dtype.itemsize for w, b in params)
    bytes_interm = TB * 4 * (h1 + h2 + 2 * two_out)
    vmem_need = 2 * (bytes_state + bytes_out + bytes_params) + 2 * bytes_interm
    vmem_limit = int(min(max(vmem_need + (2 << 20), 32 << 20), 48 << 20))

    # Advisory cost estimate so XLA can schedule/overlap around this call.
    flops = 2 * B * (in_f * h1 + h1 * h2 + h2 * two_out)
    transcendentals = B * (h1 + h2 + 3 * two_out)
    bytes_accessed = int(state.size) * state.dtype.itemsize + bytes_params + B * two_out * 4

    out = pl.pallas_call(
        actor_kernel,
        grid=grid,
        in_specs=[
            pl.BlockSpec((TB, in_f), lambda i: (i, 0)),
            param_spec(w0.shape), param_spec(b0.shape),
            param_spec(w1.shape), param_spec(b1.shape),
            param_spec(w2.shape), param_spec(b2.shape),
        ],
        out_specs=pl.BlockSpec((TB, two_out), lambda i: (i, 0)),
        out_shape=jax.ShapeDtypeStruct((B, two_out), jnp.float32),
        compiler_params=pltpu.CompilerParams(
            dimension_semantics=("parallel",),
            vmem_limit_bytes=vmem_limit),
        cost_estimate=pl.CostEstimate(
            flops=flops,
            transcendentals=transcendentals,
            bytes_accessed=bytes_accessed),
    )(state, w0, b0, w1, b1, w2, b2)

    mean = out[:, :out_f]
    stddev = out[:, out_f:]
    return mean, stddev


def actor_reference(state, params):
    """Pure-JAX reference mirroring the kernel's exact dtype handling."""
    mm_dtype = params[0][0].dtype
    h = state.astype(mm_dtype)
    n = len(params)
    for i, (w, b) in enumerate(params):
        h = jnp.dot(h, w, preferred_element_type=jnp.float32) + b.astype(jnp.float32)
        if i < n - 1:
            h = _elu(h).astype(mm_dtype)
    mean, std_raw = jnp.split(h, 2, axis=-1)
    return jnp.tanh(mean), _softplus(std_raw) + 0.0001


def init_actor_params(key, in_features, layers, out_features, dtype=jnp.float32):
    """Deterministic init matching build_mlp(in, *layers, 2*out) shapes."""
    dims = [in_features, *layers, 2 * out_features]
    params = []
    for i in range(len(dims) - 1):
        key, kw, kb = jax.random.split(key, 3)
        fan_in = dims[i]
        bound = 1.0 / jnp.sqrt(fan_in)
        w = jax.random.uniform(kw, (dims[i], dims[i + 1]),
                               minval=-bound, maxval=bound,
                               dtype=jnp.float32).astype(dtype)
        b = jax.random.uniform(kb, (1, dims[i + 1]),
                               minval=-bound, maxval=bound,
                               dtype=jnp.float32).astype(dtype)
        params.append((w, b))
    return params


if __name__ == "__main__":
    # Shapes consistent with the module: Actor(in=32, out=16, layers=(64, 64))
    in_features = 32
    hidden_layers = (64, 64)
    out_features = 16

    key = jax.random.PRNGKey(0)

    # --- Test 1: float32, small batch (single tile) ---
    key, k_state, k_params = jax.random.split(key, 3)
    state_f32 = jax.random.normal(k_state, (8, in_features), dtype=jnp.float32)
    params_f32 = init_actor_params(k_params, in_features, hidden_layers,
                                   out_features, dtype=jnp.float32)

    mean, stddev = actor_forward(state_f32, params_f32)
    jax.block_until_ready((mean, stddev))
    mean_ref, std_ref = actor_reference(state_f32, params_f32)

    assert mean.shape == (8, out_features)
    assert stddev.shape == (8, out_features)
    assert jnp.allclose(mean, mean_ref, atol=1e-5, rtol=1e-5)
    assert jnp.allclose(stddev, std_ref, atol=1e-5, rtol=1e-5)
    assert bool(jnp.all(stddev > 0))

    # --- Test 2: bf16 matmul inputs (v6e/v7x path) + ragged batch (no pad copy) ---
    key, k_state2, k_params2 = jax.random.split(key, 3)
    state_bf16 = jax.random.normal(
        k_state2, (37, in_features), dtype=jnp.float32).astype(jnp.bfloat16)
    params_bf16 = init_actor_params(k_params2, in_features, hidden_layers,
                                    out_features, dtype=jnp.bfloat16)

    mean2, stddev2 = actor_forward(state_bf16, params_bf16)
    jax.block_until_ready((mean2, stddev2))
    mean2_ref, std2_ref = actor_reference(state_bf16, params_bf16)

    assert mean2.shape == (37, out_features)
    assert stddev2.shape == (37, out_features)
    assert jnp.allclose(mean2, mean2_ref, atol=1e-4, rtol=1e-4)
    assert jnp.allclose(stddev2, std2_ref, atol=1e-4, rtol=1e-4)
    assert bool(jnp.all(stddev2 > 0))

    print("KERNEL_OK")
</pallas_src>

<mosaic_0001>
module attributes {stable_mosaic.version = 11 : i64} {
  func.func @actor_kernel(%arg0: i32, %arg1: memref<8x32xf32, #tpu.memory_space<vmem>>, %arg2: memref<32x64xf32, #tpu.memory_space<vmem>>, %arg3: memref<1x64xf32, #tpu.memory_space<vmem>>, %arg4: memref<64x64xf32, #tpu.memory_space<vmem>>, %arg5: memref<1x64xf32, #tpu.memory_space<vmem>>, %arg6: memref<64x32xf32, #tpu.memory_space<vmem>>, %arg7: memref<1x32xf32, #tpu.memory_space<vmem>>, %arg8: memref<8x32xf32, #tpu.memory_space<vmem>>) attributes {dimension_semantics = [#tpu.dimension_semantics<parallel>], iteration_bounds = array<i64: 1>, scalar_prefetch = 0 : i64, scratch_operands = 0 : i64, tpu.core_type = #tpu.core_type<tc>, window_params = [{transform_indices = @transform_0, window_bounds = array<i64: 8, 32>}, {pipeline_mode = #tpu.pipeline_mode<synchronous>, transform_indices = @transform_1, window_bounds = array<i64: 32, 64>}, {pipeline_mode = #tpu.pipeline_mode<synchronous>, transform_indices = @transform_2, window_bounds = array<i64: 1, 64>}, {pipeline_mode = #tpu.pipeline_mode<synchronous>, transform_indices = @transform_3, window_bounds = array<i64: 64, 64>}, {pipeline_mode = #tpu.pipeline_mode<synchronous>, transform_indices = @transform_4, window_bounds = array<i64: 1, 64>}, {pipeline_mode = #tpu.pipeline_mode<synchronous>, transform_indices = @transform_5, window_bounds = array<i64: 64, 32>}, {pipeline_mode = #tpu.pipeline_mode<synchronous>, transform_indices = @transform_6, window_bounds = array<i64: 1, 32>}, {transform_indices = @transform_7, window_bounds = array<i64: 8, 32>}]} {
    %c0 = arith.constant 0 : index
    %c0_0 = arith.constant 0 : index
    %0 = vector.load %arg1[%c0, %c0_0] : memref<8x32xf32, #tpu.memory_space<vmem>>, vector<8x32xf32>
    %c0_1 = arith.constant 0 : index
    %c0_2 = arith.constant 0 : index
    %1 = vector.load %arg2[%c0_1, %c0_2] : memref<32x64xf32, #tpu.memory_space<vmem>>, vector<32x64xf32>
    %cst = arith.constant dense<0.000000e+00> : vector<8x64xf32>
    %2 = tpu.matmul %0, %1, %cst {dimension_numbers = #tpu.dot_dimension_numbers<[1], [0], [0], [1], [0, 0, 1, 1], [], []>} : vector<8x32xf32>, vector<32x64xf32>, vector<8x64xf32> -> vector<8x64xf32>
    %c0_3 = arith.constant 0 : index
    %c0_4 = arith.constant 0 : index
    %3 = vector.load %arg3[%c0_3, %c0_4] : memref<1x64xf32, #tpu.memory_space<vmem>>, vector<1x64xf32>
    %4 = vector.broadcast %3 : vector<1x64xf32> to vector<8x64xf32>
    %5 = arith.addf %2, %4 : vector<8x64xf32>
    %cst_5 = arith.constant 0.000000e+00 : f32
    %6 = vector.broadcast %cst_5 : f32 to vector<8x64xf32>
    %7 = arith.cmpf ogt, %5, %6 : vector<8x64xf32>
    %cst_6 = arith.constant 0.000000e+00 : f32
    %8 = vector.broadcast %cst_6 : f32 to vector<8x64xf32>
    %9 = arith.minimumf %5, %8 : vector<8x64xf32>
    %10 = math.exp %9 : vector<8x64xf32>
    %cst_7 = arith.constant 1.000000e+00 : f32
    %11 = vector.broadcast %cst_7 : f32 to vector<8x64xf32>
    %12 = arith.subf %10, %11 : vector<8x64xf32>
    %13 = arith.select %7, %5, %12 : vector<8x64xi1>, vector<8x64xf32>
    %c0_8 = arith.constant 0 : index
    %c0_9 = arith.constant 0 : index
    %14 = vector.load %arg4[%c0_8, %c0_9] : memref<64x64xf32, #tpu.memory_space<vmem>>, vector<64x64xf32>
    %cst_10 = arith.constant dense<0.000000e+00> : vector<8x64xf32>
    %15 = tpu.matmul %13, %14, %cst_10 {dimension_numbers = #tpu.dot_dimension_numbers<[1], [0], [0], [1], [0, 0, 1, 1], [], []>} : vector<8x64xf32>, vector<64x64xf32>, vector<8x64xf32> -> vector<8x64xf32>
    %c0_11 = arith.constant 0 : index
    %c0_12 = arith.constant 0 : index
    %16 = vector.load %arg5[%c0_11, %c0_12] : memref<1x64xf32, #tpu.memory_space<vmem>>, vector<1x64xf32>
    %17 = vector.broadcast %16 : vector<1x64xf32> to vector<8x64xf32>
    %18 = arith.addf %15, %17 : vector<8x64xf32>
    %cst_13 = arith.constant 0.000000e+00 : f32
    %19 = vector.broadcast %cst_13 : f32 to vector<8x64xf32>
    %20 = arith.cmpf ogt, %18, %19 : vector<8x64xf32>
    %cst_14 = arith.constant 0.000000e+00 : f32
    %21 = vector.broadcast %cst_14 : f32 to vector<8x64xf32>
    %22 = arith.minimumf %18, %21 : vector<8x64xf32>
    %23 = math.exp %22 : vector<8x64xf32>
    %cst_15 = arith.constant 1.000000e+00 : f32
    %24 = vector.broadcast %cst_15 : f32 to vector<8x64xf32>
    %25 = arith.subf %23, %24 : vector<8x64xf32>
    %26 = arith.select %20, %18, %25 : vector<8x64xi1>, vector<8x64xf32>
    %c0_16 = arith.constant 0 : index
    %c0_17 = arith.constant 0 : index
    %27 = vector.load %arg6[%c0_16, %c0_17] : memref<64x32xf32, #tpu.memory_space<vmem>>, vector<64x32xf32>
    %cst_18 = arith.constant dense<0.000000e+00> : vector<8x32xf32>
    %28 = tpu.matmul %26, %27, %cst_18 {dimension_numbers = #tpu.dot_dimension_numbers<[1], [0], [0], [1], [0, 0, 1, 1], [], []>} : vector<8x64xf32>, vector<64x32xf32>, vector<8x32xf32> -> vector<8x32xf32>
    %c0_19 = arith.constant 0 : index
    %c0_20 = arith.constant 0 : index
    %29 = vector.load %arg7[%c0_19, %c0_20] : memref<1x32xf32, #tpu.memory_space<vmem>>, vector<1x32xf32>
    %30 = vector.broadcast %29 : vector<1x32xf32> to vector<8x32xf32>
    %31 = arith.addf %28, %30 : vector<8x32xf32>
    %32 = tpu.iota {dimensions = array<i32: 1>} : vector<8x32xi32>
    %33 = math.tanh %31 : vector<8x32xf32>
    %cst_21 = arith.constant 0.000000e+00 : f32
    %34 = vector.broadcast %cst_21 : f32 to vector<8x32xf32>
    %35 = arith.maximumf %31, %34 : vector<8x32xf32>
    %36 = math.absf %31 : vector<8x32xf32>
    %cst_22 = arith.constant 0.000000e+00 : f32
    %37 = vector.broadcast %cst_22 : f32 to vector<8x32xf32>
    %38 = arith.subf %37, %36 : vector<8x32xf32>
    %39 = math.exp %38 : vector<8x32xf32>
    %40 = math.log1p %39 : vector<8x32xf32>
    %41 = arith.addf %35, %40 : vector<8x32xf32>
    %cst_23 = arith.constant 9.99999974E-5 : f32
    %42 = vector.broadcast %cst_23 : f32 to vector<8x32xf32>
    %43 = arith.addf %41, %42 : vector<8x32xf32>
    %c16_i32 = arith.constant 16 : i32
    %44 = vector.broadcast %c16_i32 : i32 to vector<8x32xi32>
    %45 = arith.cmpi slt, %32, %44 : vector<8x32xi32>
    %46 = arith.select %45, %33, %43 : vector<8x32xi1>, vector<8x32xf32>
    %c0_24 = arith.constant 0 : index
    %c0_25 = arith.constant 0 : index
    %47 = vector.load %arg8[%c0_24, %c0_25] : memref<8x32xf32, #tpu.memory_space<vmem>>, vector<8x32xf32>
    tpu.vector_store %arg8[%c0_24, %c0_25], %46 {strides = array<i32>} : memref<8x32xf32, #tpu.memory_space<vmem>>, vector<8x32xf32>,
    return
  }
  func.func @transform_0(%arg0: i32) -> (i32, i32) {
    %c0_i32 = arith.constant 0 : i32
    %c0_i32_0 = arith.constant 0 : i32
    return %arg0, %c0_i32 : i32, i32
  }
  func.func @transform_1(%arg0: i32) -> (i32, i32) {
    %c0_i32 = arith.constant 0 : i32
    %c0_i32_0 = arith.constant 0 : i32
    %c0_i32_1 = arith.constant 0 : i32
    return %c0_i32, %c0_i32_0 : i32, i32
  }
  func.func @transform_2(%arg0: i32) -> (i32, i32) {
    %c0_i32 = arith.constant 0 : i32
    %c0_i32_0 = arith.constant 0 : i32
    %c0_i32_1 = arith.constant 0 : i32
    return %c0_i32, %c0_i32_0 : i32, i32
  }
  func.func @transform_3(%arg0: i32) -> (i32, i32) {
    %c0_i32 = arith.constant 0 : i32
    %c0_i32_0 = arith.constant 0 : i32
    %c0_i32_1 = arith.constant 0 : i32
    return %c0_i32, %c0_i32_0 : i32, i32
  }
  func.func @transform_4(%arg0: i32) -> (i32, i32) {
    %c0_i32 = arith.constant 0 : i32
    %c0_i32_0 = arith.constant 0 : i32
    %c0_i32_1 = arith.constant 0 : i32
    return %c0_i32, %c0_i32_0 : i32, i32
  }
  func.func @transform_5(%arg0: i32) -> (i32, i32) {
    %c0_i32 = arith.constant 0 : i32
    %c0_i32_0 = arith.constant 0 : i32
    %c0_i32_1 = arith.constant 0 : i32
    return %c0_i32, %c0_i32_0 : i32, i32
  }
  func.func @transform_6(%arg0: i32) -> (i32, i32) {
    %c0_i32 = arith.constant 0 : i32
    %c0_i32_0 = arith.constant 0 : i32
    %c0_i32_1 = arith.constant 0 : i32
    return %c0_i32, %c0_i32_0 : i32, i32
  }
  func.func @transform_7(%arg0: i32) -> (i32, i32) {
    %c0_i32 = arith.constant 0 : i32
    %c0_i32_0 = arith.constant 0 : i32
    return %arg0, %c0_i32 : i32, i32
  }
}

</mosaic_0001>

<bundles_post_ra>
// kernel: tpu_custom_call.1
= control target key start
LH: loop header
LB: loop body
LE: loop exit
PB: predicated region body
PF: predicated region fallthrough
CT: control target
= control target key end

     0   :  { %12 = vsyncpa [#allocation3], 0  ;;  %s638_s0 = inlined_call_operand.hbm [shape: f32[8,32], index: 0, kind: input, shape index: {}]   ;;  %s639_s1 = inlined_call_operand.vmem [shape: f32[32,64], index: 1, kind: input, shape index: {}]   ;;  %s640_s2 = inlined_call_operand.vmem [shape: f32[1,64], index: 2, kind: input, shape index: {}]   ;;  %s641_s3 = inlined_call_operand.vmem [shape: f32[64,64], index: 3, kind: input, shape index: {}]   ;;  %s642_s4 = inlined_call_operand.vmem [shape: f32[1,64], index: 4, kind: input, shape index: {}]   ;;  %s643_s5 = inlined_call_operand.vmem [shape: f32[64,32], index: 5, kind: input, shape index: {}]   ;;  %s644_s6 = inlined_call_operand.vmem [shape: f32[1,32], index: 6, kind: input, shape index: {}]   ;;  %s645_s7 = inlined_call_operand.hbm [shape: f32[8,32], index: 7, kind: output, shape index: {}]  }
   0x1   :  { %13 = vsyncpa [#allocation4], 0  ;;  %s489_s24 = smov [#allocation2]  }
   0x2   :  { %s20_s25 = sshll.u32 %s489_s24, 4  ;;  %s21_s25 = int_to_ptr.vmem [resolvable:$true] %s20_s25 }
   0x3   :  { %s453_s26 = scalar_lea.vmem %s21_s25, 128  ;;  %p458_p1 = scmp.lt.s32.totalorder %s21_s25, %s21_s25 }
   0x4   :  { %p454_p0 = scmp.ne.s32.totalorder %s21_s25, %s453_s26  ;;  %p459_p2 = scmp.lt.s32.totalorder %s453_s26, %s453_s26 }
   0x6   :  { %p460_p3 = por %p459_p2, %p458_p1 }
   0x8   :  { %p461_p4 = pnand %p460_p3, %p454_p0 }
   0xa   :  { %464 = shalt.err (!%p461_p4)
}
   0xb   :  { %23 = dma.hbm_to_vmem [thread:$0]  %s638_s0, 128, %s21_s25, [#allocation3]  }
   0xc   :  { %485 = dma.done.wait [#allocation3], 128  }
   0xd   :  { %486 = vsyncadd [#allocation3], 4294967168  ;;  %v490_v0 = vmov 0.0   ;;  %vm491_vm0 = vmmov 0   ;;  %v43_v1 = vld [vmem:[%s639_s1 + $0x18] sm:$0xff]  ;;  %v42_v2 = vld [vmem:[%s639_s1 + $0x10] sm:$0xff]  ;;  %v314_v51 = vlaneseq }
   0xe   :  { %382 = vmatprep.subr.mxu0 %v490_v0  ;;  %390 = vmatprep.mubr.msk.f32.mxu0 %vm491_vm0, %v490_v0  ;;  %v41_v3 = vld [vmem:[%s639_s1 + $0x8] sm:$0xff]  ;;  %v40_v4 = vld [vmem:[%s639_s1] sm:$0xff]  ;;  %vm51_vm1 = vcmask 261120   ;;  %v138_v6 = vld [vmem:[%s641_s3 + $0x38] sm:$0xff]  ;;  %vm146_vm2 = vcmask 523264  }
   0xf   :  { %393 = vmatprep.subr.mxu1 %v490_v0  ;;  %409 = vmatprep.mubr.msk.f32.mxu1 %vm491_vm0, %v490_v0  ;;  %v39_v5 = vld [vmem:[#allocation2] sm:$0xff]  ;;  %v137_v7 = vld [vmem:[%s641_s3 + $0x30] sm:$0xff]  ;;  %v136_v8 = vld [vmem:[%s641_s3 + $0x28] sm:$0xff]  ;;  %v315_v56 = vand.u32 127, %v314_v51 }
  0x10   :  { %383 = vmatpush3.msra.mxu0 %v43_v1  ;;  %394 = vmatpush3.msra.mxu1 %v138_v6  ;;  %v135_v9 = vld [vmem:[%s641_s3 + $0x20] sm:$0xff]  ;;  %v134_v10 = vld [vmem:[%s641_s3 + $0x18] sm:$0xff]  ;;  %v133_v11 = vld [vmem:[%s641_s3 + $0x10] sm:$0xff] }
  0x11   :  { %384 = vmatprep.subr.mxu0 %v490_v0  ;;  %395 = vmatprep.subr.mxu1 %v490_v0  ;;  %v132_v12 = vld [vmem:[%s641_s3 + $0x8] sm:$0xff]  ;;  %v131_v13 = vld [vmem:[%s641_s3] sm:$0xff]  ;;  %v233_v23 = vld [vmem:[%s643_s5 + $0x38] sm:$0xff]  ;;  %vm333_vm6 = vcmp.lt.s32.totalorder %v315_v56, 16 }
  0x12   :  { %385 = vmatpush3.msra.mxu0 %v42_v2  ;;  %396 = vmatpush3.msra.mxu1 %v137_v7  ;;  %v351_v14 = vld [vmem:[%s640_s2] ss:$0 sm:$0xff]  ;;  %v232_v24 = vld [vmem:[%s643_s5 + $0x30] sm:$0xff]  ;;  %v231_v25 = vld [vmem:[%s643_s5 + $0x28] sm:$0xff] }
  0x13   :  { %386 = vmatprep.subr.mxu0 %v490_v0  ;;  %397 = vmatprep.subr.mxu1 %v490_v0  ;;  %v230_v26 = vld [vmem:[%s643_s5 + $0x20] sm:$0xff]  ;;  %v229_v27 = vld [vmem:[%s643_s5 + $0x18] sm:$0xff]  ;;  %v228_v28 = vld [vmem:[%s643_s5 + $0x10] sm:$0xff] }
  0x14   :  { %387 = vmatpush3.msra.mxu0 %v41_v3  ;;  %398 = vmatpush3.msra.mxu1 %v136_v8  ;;  %v227_v29 = vld [vmem:[%s643_s5 + $0x8] sm:$0xff]  ;;  %v226_v30 = vld [vmem:[%s643_s5] sm:$0xff] }
  0x15   :  { %388 = vmatprep.subr.mxu0 %v490_v0  ;;  %399 = vmatprep.subr.mxu1 %v490_v0  ;;  %v354_v31 = vld [vmem:[%s642_s4] ss:$0 sm:$0xff]  ;;  %s492_s4 = smov [#allocation5]  }
  0x16   :  { %389 = vmatpush3.msra.mxu0 %v40_v4  ;;  %400 = vmatpush3.msra.mxu1 %v135_v9  ;;  %v357_v40 = vld [vmem:[%s644_s6] ss:$0 sm:$0xff]  ;;  %s342_s5 = sshll.u32 %s492_s4, 4  ;;  %s343_s5 = int_to_ptr.vmem [resolvable:$true] %s342_s5 }
  0x17   :  { %391 = vmatmul.mubr.msk.f32.vlgmr.msra.gmra.mxu0 %vm51_vm1, %v39_v5  ;;  %412 = vmatprep.subr.mxu0 %v490_v0  ;;  %s465_s6 = scalar_lea.vmem %s343_s5, 128  ;;  %p470_p6 = scmp.lt.s32.totalorder %s343_s5, %s343_s5 }
  0x18   :  { %428 = vmatprep.mubr.msk.f32.mxu0 %vm491_vm0, %v490_v0  ;;  %401 = vmatprep.subr.mxu1 %v490_v0  ;;  %p466_p5 = scmp.ne.s32.totalorder %s343_s5, %s465_s6  ;;  %p471_p7 = scmp.lt.s32.totalorder %s465_s6, %s465_s6 }
  0x19   :  { %402 = vmatpush3.msra.mxu1 %v134_v10  ;;  %413 = vmatpush3.msra.mxu0 %v233_v23 }
  0x1a   :  { %403 = vmatprep.subr.mxu1 %v490_v0  ;;  %414 = vmatprep.subr.mxu0 %v490_v0  ;;  %p472_p8 = por %p471_p7, %p470_p6 }
  0x1b   :  { %404 = vmatpush3.msra.mxu1 %v133_v11  ;;  %415 = vmatpush3.msra.mxu0 %v232_v24 }
  0x1c   :  { %405 = vmatprep.subr.mxu1 %v490_v0  ;;  %416 = vmatprep.subr.mxu0 %v490_v0  ;;  %p473_p9 = pnand %p472_p8, %p466_p5 }
  0x1d   :  { %406 = vmatpush3.msra.mxu1 %v132_v12  ;;  %417 = vmatpush3.msra.mxu0 %v231_v25 }
  0x1e   :  { %407 = vmatprep.subr.mxu1 %v490_v0  ;;  %418 = vmatprep.subr.mxu0 %v490_v0 }
  0x1f   :  { %408 = vmatpush3.msra.mxu1 %v131_v13  ;;  %419 = vmatpush3.msra.mxu0 %v230_v26 }
  0x20   :  { %420 = vmatprep.subr.mxu0 %v490_v0 }
  0x21   :  { %421 = vmatpush3.msra.mxu0 %v229_v27 }
  0x22   :  { %422 = vmatprep.subr.mxu0 %v490_v0 }
  0x23   :  { %423 = vmatpush3.msra.mxu0 %v228_v28 }
  0x24   :  { %424 = vmatprep.subr.mxu0 %v490_v0 }
  0x25   :  { %425 = vmatpush3.msra.mxu0 %v227_v29 }
  0x26   :  { %426 = vmatprep.subr.mxu0 %v490_v0 }
  0x27   :  { %427 = vmatpush3.msra.mxu0 %v226_v30 }
  0xd7   :  { %v121_v15 = vpop.f32.mrf.mxu0 }
  0xd8   :  { %v122_v16 = vadd.f32 %v351_v14, %v121_v15 }
  0xd9   :  { %v392_v17 = vpop.f32.mrf.mxu0 }
  0xda   :  { %v126_v18 = vmin.f32 %v122_v16, 0.0  ;;  %vm125_vm3 = vcmp.gt.f32.partialorder %v122_v16, 0.0 }
  0xdc   :  { %v127_v19 = vmul.f32 1.442695, %v126_v18 }
  0xde   :  { %435 = vpow2.f32 %v127_v19 }
  0xeb   :  { %v436_v20 = vpop.eup %435 }
  0xec   :  { %v353_v21 = vadd.f32 -1.0, %v436_v20 }
  0xee   :  { %v130_v22 = vsel %vm125_vm3, %v122_v16, %v353_v21 }
  0xef   :  { %410 = vmatmul.mubr.msk.f32.vlgmr.msra.gmra.mxu1 %vm146_vm2, %v130_v22 }
 0x1af   :  { %v216_v32 = vpop.f32.mrf.mxu1 }
 0x1b0   :  { %v217_v33 = vadd.f32 %v354_v31, %v216_v32 }
 0x1b1   :  { %v411_v34 = vpop.f32.mrf.mxu1 }
 0x1b2   :  { %v221_v35 = vmin.f32 %v217_v33, 0.0  ;;  %vm220_vm4 = vcmp.gt.f32.partialorder %v217_v33, 0.0 }
 0x1b4   :  { %v222_v36 = vmul.f32 1.442695, %v221_v35 }
 0x1b6   :  { %437 = vpow2.f32 %v222_v36 }
 0x1c3   :  { %v438_v37 = vpop.eup %437 }
 0x1c4   :  { %v356_v38 = vadd.f32 -1.0, %v438_v37 }
 0x1c6   :  { %v225_v39 = vsel %vm220_vm4, %v217_v33, %v356_v38 }
 0x1c7   :  { %429 = vmatmul.mubr.msk.f32.vlgmr.msra.gmra.mxu0 %vm146_vm2, %v225_v39 }
 0x287   :  { %v310_v41 = vpop.f32.mrf.mxu0 }
 0x288   :  { %v311_v42 = vadd.f32 %v357_v40, %v310_v41 }
 0x289   :  { %v430_v43 = vpop.f32.mrf.mxu0 }
 0x28a   :  { %v318_v44 = vand.u32 2147483647, %v311_v42  ;;  %v317_v57 = vmax.f32 %v311_v42, 0.0 }
 0x28c   :  { %v319_v45 = vsub.f32 0.0, %v318_v44 }
 0x28e   :  { %v320_v46 = vmul.f32 1.442695, %v319_v45 }
 0x290   :  { %439 = vpow2.f32 %v320_v46 }
 0x29d   :  { %v440_v47 = vpop.eup %439 }
 0x29e   :  { %v322_v48 = vadd.f32 1.0, %v440_v47  ;;  %v325_v49 = vmul.f32 -0.5, %v440_v47  ;;  %v328_v52 = vand.u32 2147483647, %v440_v47 }
 0x2a0   :  { %441 = vlog2.f32 %v322_v48  ;;  %v326_v50 = vadd.f32 1.0, %v325_v49  ;;  %vm329_vm5 = vcmp.lt.f32.partialorder %v328_v52, 0.0004427343 }
 0x2a1   :  { %443 = vtanh.f32 %v311_v42 }
 0x2a2   :  { %v327_v55 = vmul.f32 %v440_v47, %v326_v50 }
 0x2ad   :  { %v442_v53 = vpop.eup %441 }
 0x2ae   :  { %v324_v54 = vmul.f32 0.6931472, %v442_v53  ;;  %v444_v61 = vpop.eup %443 }
 0x2b0   :  { %v330_v58 = vsel %vm329_vm5, %v327_v55, %v324_v54 }
 0x2b1   :  { %v331_v59 = vadd.f32 %v330_v58, %v317_v57 }
 0x2b3   :  { %v332_v60 = vadd.f32 0.0001, %v331_v59 }
 0x2b5   :  { %v334_v62 = vsel %vm333_vm6, %v444_v61, %v332_v60 }
 0x2b6   :  { %335 = vst.msk [vmem:[#allocation5] sm:$0xff] %vm51_vm1, %v334_v62 }
 0x2b7   :  { %476 = shalt.err (!%p473_p9)
}
 0x2b8   :  { %345 = dma.vmem_to_hbm [thread:$0]  %s343_s5, 128, %s645_s7, [#allocation4]  }
 0x2b9   :  { %487 = dma.done.wait [#allocation4], 128  }
 0x2ba   :  { %488 = vsyncadd [#allocation4], 4294967168 }
 0x2bb   :  { %349 = vsyncpa [#allocation3], 1 }
 0x2bc   :  { %350 = vsyncpa [#allocation4], 1 }

</bundles_post_ra>
